<compile_context>
chip_gen: v6e
topology: v6e:2x2x1
jax: 0.10.0
libtpu: 0.0.40
codegen_flags: <defaults>
</compile_context>

<pallas_src>
import math

import jax
import jax.numpy as jnp
from jax.experimental import pallas as pl
from jax.experimental.pallas import tpu as pltpu


# Lane widths to try for the dense slab (large -> small, all multiples of 128).
_LANE_CANDIDATES = (4096, 2048, 1024, 512, 256, 128)

# Per-block VMEM footprint cap.  2 MiB/block -> at most ~8 MiB of
# double-buffered input+output VMEM, comfortably inside the scoped-VMEM
# default on v5e (16 MiB), v6e (32 MiB) and v7x (32 MiB of 64 MiB physical).
_BLOCK_BYTES_CAP = 2 * 1024 * 1024


def _copy_kernel(x_ref, o_ref):
    # Pure data movement: copy the current (row_tile, lane) block.
    o_ref[...] = x_ref[...]


def _sublane_multiple(itemsize: int) -> int:
    # Packed-sublane multiple per element width: f32->8, bf16->16, int8/fp8->32.
    return {4: 8, 2: 16, 1: 32}.get(itemsize, 8)


def _pick_lane(total: int, sub: int):
    # Prefer the largest lane width that also leaves >= `sub` rows (so the
    # row axis can be sublane-dense); otherwise any lane width that divides.
    for cand in _LANE_CANDIDATES:
        if total % cand == 0 and (total // cand) >= sub:
            return cand
    for cand in _LANE_CANDIDATES:
        if total % cand == 0:
            return cand
    return None


def _pick_row_tile(rows: int, lane: int, itemsize: int, sub: int) -> int:
    # Largest row tile (multiple of `sub`) whose block stays under the cap.
    max_rows = max(sub, ((_BLOCK_BYTES_CAP // (lane * itemsize)) // sub) * sub)
    if rows <= max_rows:
        # Whole slab fits one block; split in two when it is free so the grid
        # has >= 2 steps and v7x can shard the copy across its 2 TensorCores.
        half = rows // 2
        if rows % 2 == 0 and half >= sub and half % sub == 0:
            return half
        return rows  # full-extent row block (always a legal block shape)
    # Largest multiple of `sub` <= max_rows that divides rows exactly.
    t = max_rows
    while t >= sub:
        if rows % t == 0:
            return t
        t -= sub
    # No exact divisor: use a cdiv grid; Pallas masks the ragged last block.
    return max_rows


def flatten(x: jax.Array) -> jax.Array:
    """Equivalent of PyTorch `x.view(x.size(0), -1)`."""
    n = x.shape[0]
    f = math.prod(x.shape[1:])
    total = n * f
    itemsize = jnp.dtype(x.dtype).itemsize
    sub = _sublane_multiple(itemsize)

    lane = _pick_lane(total, sub)
    if lane is None:
        # Too small / awkward to tile lane-densely.  Flatten is metadata-only,
        # so return the free reshape instead of forcing an HBM round trip.
        return jnp.reshape(x, (n, f))

    rows = total // lane
    row_tile = _pick_row_tile(rows, lane, itemsize, sub)
    grid = (pl.cdiv(rows, row_tile),)

    # Metadata-only: view the contiguous buffer as a lane/sublane-dense slab.
    x_slab = jnp.reshape(x, (rows, lane))

    out_slab = pl.pallas_call(
        _copy_kernel,
        out_shape=jax.ShapeDtypeStruct((rows, lane), x.dtype),
        grid_spec=pltpu.PrefetchScalarGridSpec(
            num_scalar_prefetch=0,
            grid=grid,
            in_specs=[pl.BlockSpec((row_tile, lane), lambda i: (i, 0))],
            out_specs=pl.BlockSpec((row_tile, lane), lambda i: (i, 0)),
        ),
        compiler_params=pltpu.CompilerParams(
            dimension_semantics=("parallel",),
        ),
        cost_estimate=pl.CostEstimate(
            flops=0,
            transcendentals=0,
            bytes_accessed=2 * total * itemsize,
        ),
    )(x_slab)

    # Metadata-only: back to the (N, C*H*W) view PyTorch's Flatten returns.
    return jnp.reshape(out_slab, (n, f))


if __name__ == "__main__":
    key = jax.random.PRNGKey(0)
    # Small NCHW input consistent with a conv-feature-map flatten.
    x = jax.random.normal(key, (2, 4, 16, 16), dtype=jnp.float32)

    y = jax.block_until_ready(flatten(x))

    # Reference: plain JAX reshape (same semantics as torch .view(N, -1)).
    y_ref = jnp.reshape(x, (x.shape[0], -1))

    assert y.shape == (2, 4 * 16 * 16), y.shape
    assert y.dtype == x.dtype
    assert bool(jnp.array_equal(y, y_ref))

    print("KERNEL_OK")
</pallas_src>

<mosaic_0001>
module attributes {stable_mosaic.version = 11 : i64} {
  func.func @_copy_kernel(%arg0: i32, %arg1: memref<8x256xf32, #tpu.memory_space<vmem>>, %arg2: memref<8x256xf32, #tpu.memory_space<vmem>>) attributes {dimension_semantics = [#tpu.dimension_semantics<parallel>], iteration_bounds = array<i64: 1>, scalar_prefetch = 0 : i64, scratch_operands = 0 : i64, tpu.core_type = #tpu.core_type<tc>, window_params = [{transform_indices = @transform_0, window_bounds = array<i64: 8, 256>}, {transform_indices = @transform_1, window_bounds = array<i64: 8, 256>}]} {
    %c0 = arith.constant 0 : index
    %c0_0 = arith.constant 0 : index
    %0 = vector.load %arg1[%c0, %c0_0] : memref<8x256xf32, #tpu.memory_space<vmem>>, vector<8x256xf32>
    %c0_1 = arith.constant 0 : index
    %c0_2 = arith.constant 0 : index
    %1 = vector.load %arg2[%c0_1, %c0_2] : memref<8x256xf32, #tpu.memory_space<vmem>>, vector<8x256xf32>
    tpu.vector_store %arg2[%c0_1, %c0_2], %0 {strides = array<i32>} : memref<8x256xf32, #tpu.memory_space<vmem>>, vector<8x256xf32>,
    return
  }
  func.func @transform_0(%arg0: i32) -> (i32, i32) {
    %c0_i32 = arith.constant 0 : i32
    %c0_i32_0 = arith.constant 0 : i32
    return %arg0, %c0_i32 : i32, i32
  }
  func.func @transform_1(%arg0: i32) -> (i32, i32) {
    %c0_i32 = arith.constant 0 : i32
    %c0_i32_0 = arith.constant 0 : i32
    return %arg0, %c0_i32 : i32, i32
  }
}

</mosaic_0001>

<bundles_post_ra>
// kernel: tpu_custom_call.1
= control target key start
LH: loop header
LB: loop body
LE: loop exit
PB: predicated region body
PF: predicated region fallthrough
CT: control target
= control target key end

     0   :  { %6 = vsyncpa [#allocation3], 0  ;;  %s104_s0 = inlined_call_operand.hbm [shape: f32[8,256], index: 0, kind: input, shape index: {}]   ;;  %s105_s1 = inlined_call_operand.hbm [shape: f32[8,256], index: 1, kind: output, shape index: {}]  }
   0x1   :  { %7 = vsyncpa [#allocation4], 0  ;;  %s86_s6 = smov [#allocation2]  }
   0x2   :  { %s14_s7 = sshll.u32 %s86_s6, 4  ;;  %s15_s7 = int_to_ptr.vmem [resolvable:$true] %s14_s7 }
   0x3   :  { %s50_s8 = scalar_lea.vmem %s15_s7, 256  ;;  %p55_p1 = scmp.lt.s32.totalorder %s15_s7, %s15_s7 }
   0x4   :  { %p51_p0 = scmp.ne.s32.totalorder %s15_s7, %s50_s8  ;;  %p56_p2 = scmp.lt.s32.totalorder %s50_s8, %s50_s8 }
   0x6   :  { %p57_p3 = por %p56_p2, %p55_p1 }
   0x8   :  { %p58_p4 = pnand %p57_p3, %p51_p0 }
   0xa   :  { %61 = shalt.err (!%p58_p4)
}
   0xb   :  { %17 = dma.hbm_to_vmem [thread:$0]  %s104_s0, 256, %s15_s7, [#allocation3]  }
   0xc   :  { %82 = dma.done.wait [#allocation3], 256  }
   0xd   :  { %83 = vsyncadd [#allocation3], 4294967040  ;;  %s87_s11 = smov [#allocation5]   ;;  %v21_v0 = vld [vmem:[#allocation2] sm:$0xff]  ;;  %v22_v1 = vld [vmem:[#allocation2 + $0x8] sm:$0xff] }
   0xe   :  { %s31_s12 = sshll.u32 %s87_s11, 4  ;;  %23 = vst [vmem:[#allocation5] sm:$0xff] %v21_v0  ;;  %24 = vst [vmem:[#allocation5 + $0x8] sm:$0xff] %v22_v1  ;;  %s32_s12 = int_to_ptr.vmem [resolvable:$true] %s31_s12 }
   0xf   :  { %s62_s13 = scalar_lea.vmem %s32_s12, 256  ;;  %p67_p6 = scmp.lt.s32.totalorder %s32_s12, %s32_s12 }
  0x10   :  { %p63_p5 = scmp.ne.s32.totalorder %s32_s12, %s62_s13  ;;  %p68_p7 = scmp.lt.s32.totalorder %s62_s13, %s62_s13 }
  0x12   :  { %p69_p8 = por %p68_p7, %p67_p6 }
  0x14   :  { %p70_p9 = pnand %p69_p8, %p63_p5 }
  0x16   :  { %73 = shalt.err (!%p70_p9)
}
  0x17   :  { %34 = dma.vmem_to_hbm [thread:$0]  %s32_s12, 256, %s105_s1, [#allocation4]  }
  0x18   :  { %84 = dma.done.wait [#allocation4], 256  }
  0x19   :  { %85 = vsyncadd [#allocation4], 4294967040 }
  0x1a   :  { %38 = vsyncpa [#allocation3], 1 }
  0x1b   :  { %39 = vsyncpa [#allocation4], 1 }

</bundles_post_ra>
